<compile_context>
chip_gen: v7x
topology: tpu7x:2x2x1
jax: 0.10.0
libtpu: 0.0.40
codegen_flags: <defaults>
</compile_context>

<pallas_src>
import jax
import jax.numpy as jnp
from jax.experimental import pallas as pl
from jax.experimental.pallas import tpu as pltpu


def _round_up(x: int, m: int) -> int:
    return (x + m - 1) // m * m


def _node_tiling(n: int, d_in: int, d_out: int, x_bytes: int = 4):
    """Pad node count to a lane multiple; pick the biggest node tile that fits
    a conservative (v5e-safe) scoped-VMEM budget with double buffering."""
    n_pad = _round_up(n, 128)
    per_col = 2 * (d_in * x_bytes + 3 * d_out * 4)     # 2 pipeline buffers per stream
    budget = 12 * 1024 * 1024                          # under default scoped VMEM on all chips
    tn_cap = max(128, (budget // per_col) // 128 * 128)
    if n_pad <= tn_cap:
        return n_pad, n_pad                            # single tile per batch step
    nt = -(-n_pad // tn_cap)
    tile = _round_up(-(-n_pad // nt), 128)
    return tile * nt, tile


# ---------------------------------------------------------------------------
# Pallas kernel: fused (transposed) Linear + per-(time, node, channel) affine
#   y^T = (W^T @ x^T) * gamma^T + beta_eff^T   with beta_eff = b*gamma + beta
# ---------------------------------------------------------------------------
def _lr_hyper_kernel(xt_ref, wt_ref, g_ref, be_ref, o_ref):
    # xt_ref: (D_in, tn) f32 or bf16   wt_ref: (D_out, D_in) bf16
    # g_ref / be_ref / o_ref: (D_out, tn) f32
    x = xt_ref[...].astype(jnp.bfloat16)               # no-op if already bf16
    y = jnp.dot(wt_ref[...], x, preferred_element_type=jnp.float32)
    o_ref[...] = (y * g_ref[...] + be_ref[...]).astype(o_ref.dtype)


def _fused_linear_affine_t(xt, wt, gamma_t, beta_t, *, tn):
    """xt:(B, D_in, N_pad) f32/bf16, wt:(D_out, D_in) bf16,
    gamma_t/beta_t:(D_out, N_pad) f32  ->  (B, D_out, N_pad) f32."""
    B, D_in, N_pad = xt.shape
    D_out = wt.shape[0]
    assert N_pad % tn == 0
    nt = N_pad // tn
    grid = (nt, B)   # node-tile outer, batch inner: W/gamma/beta stay VMEM-resident
    return pl.pallas_call(
        _lr_hyper_kernel,
        out_shape=jax.ShapeDtypeStruct((B, D_out, N_pad), jnp.float32),
        grid_spec=pltpu.PrefetchScalarGridSpec(
            num_scalar_prefetch=0,
            grid=grid,
            in_specs=[
                # X^T tile for (batch b, node tile j); batch dim squeezed.
                pl.BlockSpec((None, D_in, tn), lambda j, b: (b, 0, j)),
                # W^T: fully resident (constant block index -> fetched once).
                pl.BlockSpec((D_out, D_in), lambda j, b: (0, 0)),
                # gamma^T / beta_eff^T: indexed by node tile only (batch-invariant).
                pl.BlockSpec((D_out, tn), lambda j, b: (0, j)),
                pl.BlockSpec((D_out, tn), lambda j, b: (0, j)),
            ],
            out_specs=pl.BlockSpec((None, D_out, tn), lambda j, b: (b, 0, j)),
        ),
        compiler_params=pltpu.CompilerParams(
            dimension_semantics=("parallel", "parallel")),
    )(xt, wt, gamma_t, beta_t)


# ---------------------------------------------------------------------------
# Module-equivalent wrapper
# ---------------------------------------------------------------------------
class LRHyperLearnPallas:
    def __init__(self, history_seq_len, prediction_seq_len, num_nodes,
                 input_dim, output_dim, affine=True, key=None):
        self.L = history_seq_len
        self.T = prediction_seq_len
        self.N = num_nodes
        self.C_in = input_dim
        self.C_out = output_dim
        self.affine = affine

        D_in = self.L * self.C_in
        D_out = self.T * self.C_out
        key = jax.random.PRNGKey(42) if key is None else key
        kw, kb, kg, kbe = jax.random.split(key, 4)
        # MLP((D_in, D_out), act_type=None) == single nn.Linear(D_in, D_out)
        bound = 1.0 / float(D_in) ** 0.5
        self.W = jax.random.uniform(kw, (D_in, D_out), jnp.float32, -bound, bound)
        self.b = jax.random.uniform(kb, (D_out,), jnp.float32, -bound, bound)
        # HyperLearn affine params: (T, N, C_out)
        if affine:
            self.gamma = 1.0 + 0.1 * jax.random.normal(
                kg, (self.T, self.N, self.C_out), jnp.float32)
            self.beta = 0.1 * jax.random.normal(
                kbe, (self.T, self.N, self.C_out), jnp.float32)
        else:
            self.gamma = jnp.ones((self.T, self.N, self.C_out), jnp.float32)
            self.beta = jnp.zeros((self.T, self.N, self.C_out), jnp.float32)

    def __call__(self, history_data, long_history_data, future_data,
                 epoch=0, batch_seen=0, train=False):
        # long_history_data: (B, L, N, C_in)  -- PyTorch convention
        B, L, N, C_in = long_history_data.shape
        assert (L, N, C_in) == (self.L, self.N, self.C_in)
        D_in = L * C_in
        D_out = self.T * self.C_out

        N_pad, tn = _node_tiling(N, D_in, D_out)

        # X^T per batch: (B, D_in, N_pad), row k = l*C_in + c, column = node.
        if C_in == 1 and N_pad == N:
            # (B, L, N, 1) -> (B, L, N): pure reshape, zero-copy. Kernel casts to bf16.
            xt = long_history_data.reshape(B, D_in, N)
        else:
            xt = jnp.transpose(long_history_data, (0, 1, 3, 2)).reshape(B, D_in, N)
            if N_pad != N:
                xt = jnp.pad(xt, ((0, 0), (0, 0), (0, N_pad - N)))
            xt = xt.astype(jnp.bfloat16)   # transpose+pad+convert fuse into one pass

        wt = self.W.T.astype(jnp.bfloat16)            # (D_out, D_in)

        # Per-node affine in the transposed layout; fold the Linear bias in.
        g_t = jnp.transpose(self.gamma, (0, 2, 1)).reshape(D_out, N)
        b_t = jnp.transpose(self.beta, (0, 2, 1)).reshape(D_out, N)
        beta_eff = self.b[:, None] * g_t + b_t        # (D_out, N)
        if N_pad != N:
            g_t = jnp.pad(g_t, ((0, 0), (0, N_pad - N)))
            beta_eff = jnp.pad(beta_eff, ((0, 0), (0, N_pad - N)))

        yt = _fused_linear_affine_t(
            xt, wt, g_t.astype(jnp.float32), beta_eff.astype(jnp.float32), tn=tn)

        # (B, D_out, N_pad) -> (B, T, N, C_out)   (the PyTorch return layout)
        y = yt[:, :, :N].reshape(B, self.T, self.C_out, N)
        return jnp.transpose(y, (0, 1, 3, 2))


# ---------------------------------------------------------------------------
# Pure-JAX reference (for sanity check)
# ---------------------------------------------------------------------------
def _reference(mod, long_history_data, *, bf16_inputs=False):
    B, L, N, C_in = long_history_data.shape
    x = jnp.transpose(long_history_data, (0, 2, 1, 3)).reshape(B, N, L * C_in)
    x = x.astype(jnp.float32)
    w = mod.W
    if bf16_inputs:
        x = x.astype(jnp.bfloat16).astype(jnp.float32)
        w = w.astype(jnp.bfloat16).astype(jnp.float32)
    y = x @ w + mod.b
    y = y.reshape(B, N, mod.T, mod.C_out)
    y = jnp.transpose(y, (0, 2, 1, 3))                # (B, T, N, C_out)
    return y * mod.gamma[None] + mod.beta[None]


if __name__ == "__main__":
    # Small shapes consistent with the module
    B, L, N, C_in = 2, 8, 4, 2
    T_pred, C_out = 4, 1

    key = jax.random.PRNGKey(0)
    k1, k2, k3 = jax.random.split(key, 3)
    long_history = jax.random.normal(k1, (B, L, N, C_in), jnp.float32)
    history = jax.random.normal(k2, (B, T_pred, N, C_in), jnp.float32)   # unused
    future = jax.random.normal(k3, (B, T_pred, N, C_out), jnp.float32)   # unused

    model = LRHyperLearnPallas(history_seq_len=L, prediction_seq_len=T_pred,
                               num_nodes=N, input_dim=C_in, output_dim=C_out,
                               affine=True, key=jax.random.PRNGKey(7))

    fwd = jax.jit(lambda lh: model(history, lh, future, epoch=0, batch_seen=0,
                                   train=True))
    out = jax.block_until_ready(fwd(long_history))
    assert out.shape == (B, T_pred, N, C_out), out.shape

    # Tight check against a reference using the same bf16-rounded X/W.
    ref_bf = _reference(model, long_history, bf16_inputs=True)
    assert jnp.allclose(out, ref_bf, atol=1e-4, rtol=1e-4), \
        float(jnp.max(jnp.abs(out - ref_bf)))
    # Loose check against pure-f32 module semantics (bf16 matmul inputs used).
    ref_f32 = _reference(model, long_history, bf16_inputs=False)
    assert jnp.allclose(out, ref_f32, atol=5e-2, rtol=5e-2), \
        float(jnp.max(jnp.abs(out - ref_f32)))

    print("KERNEL_OK")
</pallas_src>

<mosaic_0001>
module attributes {stable_mosaic.version = 11 : i64} {
  func.func @_lr_hyper_kernel(%arg0: i32, %arg1: i32, %arg2: memref<1x16x128xbf16, #tpu.memory_space<vmem>>, %arg3: memref<4x16xbf16, #tpu.memory_space<vmem>>, %arg4: memref<4x128xf32, #tpu.memory_space<vmem>>, %arg5: memref<4x128xf32, #tpu.memory_space<vmem>>, %arg6: memref<1x4x128xf32, #tpu.memory_space<vmem>>) attributes {dimension_semantics = [#tpu.dimension_semantics<parallel>, #tpu.dimension_semantics<parallel>], iteration_bounds = array<i64: 1, 2>, scalar_prefetch = 0 : i64, scratch_operands = 0 : i64, tpu.core_type = #tpu.core_type<tc>, window_params = [{transform_indices = @transform_0, window_bounds = array<i64: 1, 16, 128>}, {pipeline_mode = #tpu.pipeline_mode<synchronous>, transform_indices = @transform_1, window_bounds = array<i64: 4, 16>}, {transform_indices = @transform_2, window_bounds = array<i64: 4, 128>}, {transform_indices = @transform_3, window_bounds = array<i64: 4, 128>}, {transform_indices = @transform_4, window_bounds = array<i64: 1, 4, 128>}]} {
    %c0 = arith.constant 0 : index
    %c0_0 = arith.constant 0 : index
    %c0_1 = arith.constant 0 : index
    %0 = vector.load %arg2[%c0, %c0_0, %c0_1] : memref<1x16x128xbf16, #tpu.memory_space<vmem>>, vector<1x16x128xbf16>
    %1 = vector.shape_cast %0 : vector<1x16x128xbf16> to vector<16x128xbf16>
    %c0_2 = arith.constant 0 : index
    %c0_3 = arith.constant 0 : index
    %2 = vector.load %arg3[%c0_2, %c0_3] : memref<4x16xbf16, #tpu.memory_space<vmem>>, vector<4x16xbf16>
    %cst = arith.constant dense<0.000000e+00> : vector<4x128xf32>
    %3 = tpu.matmul %2, %1, %cst {dimension_numbers = #tpu.dot_dimension_numbers<[1], [0], [0], [1], [0, 0, 1, 1], [], []>} : vector<4x16xbf16>, vector<16x128xbf16>, vector<4x128xf32> -> vector<4x128xf32>
    %c0_4 = arith.constant 0 : index
    %c0_5 = arith.constant 0 : index
    %4 = vector.load %arg4[%c0_4, %c0_5] : memref<4x128xf32, #tpu.memory_space<vmem>>, vector<4x128xf32>
    %5 = arith.mulf %3, %4 : vector<4x128xf32>
    %c0_6 = arith.constant 0 : index
    %c0_7 = arith.constant 0 : index
    %6 = vector.load %arg5[%c0_6, %c0_7] : memref<4x128xf32, #tpu.memory_space<vmem>>, vector<4x128xf32>
    %7 = arith.addf %5, %6 : vector<4x128xf32>
    %c0_8 = arith.constant 0 : index
    %c0_9 = arith.constant 0 : index
    %c0_10 = arith.constant 0 : index
    %8 = vector.load %arg6[%c0_8, %c0_9, %c0_10] : memref<1x4x128xf32, #tpu.memory_space<vmem>>, vector<1x4x128xf32>
    %9 = vector.shape_cast %8 : vector<1x4x128xf32> to vector<4x128xf32>
    %10 = vector.shape_cast %7 : vector<4x128xf32> to vector<1x4x128xf32>
    tpu.vector_store %arg6[%c0_8, %c0_9, %c0_10], %10 {strides = array<i32>} : memref<1x4x128xf32, #tpu.memory_space<vmem>>, vector<1x4x128xf32>,
    return
  }
  func.func @transform_0(%arg0: i32, %arg1: i32) -> (i32, i32, i32) {
    %c0_i32 = arith.constant 0 : i32
    %c0_i32_0 = arith.constant 0 : i32
    return %arg1, %c0_i32, %arg0 : i32, i32, i32
  }
  func.func @transform_1(%arg0: i32, %arg1: i32) -> (i32, i32) {
    %c0_i32 = arith.constant 0 : i32
    %c0_i32_0 = arith.constant 0 : i32
    %c0_i32_1 = arith.constant 0 : i32
    return %c0_i32, %c0_i32_0 : i32, i32
  }
  func.func @transform_2(%arg0: i32, %arg1: i32) -> (i32, i32) {
    %c0_i32 = arith.constant 0 : i32
    %c0_i32_0 = arith.constant 0 : i32
    return %c0_i32, %arg0 : i32, i32
  }
  func.func @transform_3(%arg0: i32, %arg1: i32) -> (i32, i32) {
    %c0_i32 = arith.constant 0 : i32
    %c0_i32_0 = arith.constant 0 : i32
    return %c0_i32, %arg0 : i32, i32
  }
  func.func @transform_4(%arg0: i32, %arg1: i32) -> (i32, i32, i32) {
    %c0_i32 = arith.constant 0 : i32
    %c0_i32_0 = arith.constant 0 : i32
    return %arg1, %c0_i32, %arg0 : i32, i32, i32
  }
}

</mosaic_0001>

<bundles_post_ra>
// kernel: _lambda_.1
= control target key start
LH: loop header
LB: loop body
LE: loop exit
PB: predicated region body
PF: predicated region fallthrough
CT: control target
= control target key end

     0   :  { %9 = vsyncpa [#allocation3], 0  ;;  %s745_s0 = inlined_call_operand.vmem [shape: bf16[2,16,128], index: 0, kind: input, shape index: {}]   ;;  %s746_s1 = inlined_call_operand.vmem [shape: bf16[4,16], index: 1, kind: input, shape index: {}]   ;;  %s747_s2 = inlined_call_operand.vmem [shape: f32[4,128], index: 2, kind: input, shape index: {}]   ;;  %s748_s3 = inlined_call_operand.vmem [shape: f32[4,128], index: 3, kind: input, shape index: {}]   ;;  %s749_s4 = inlined_call_operand.hbm [shape: f32[2,4,128], index: 4, kind: output, shape index: {}]  }
   0x1   :  { %11 = vsyncpa [#allocation3 + $0x1], 0  ;;  %s624_s15 = smov 0   ;;  %s626_s16 = smov 0  }
   0x2   :  { %s628_s17 = smov 0   ;;  %s630_s18 = smov 0  }
   0x3   :  { %s632_s19 = smov 0   ;;  %s634_s20 = smov 0  }
   0x4 LB: > { %s433_s21 = sadd.s32 4294967295, %s594_s20   ;;  %s434_s22 = sadd.s32 4294967294, %s594_s20   ;;  %s594_s20 = sphi %s634_s20, %s17_s20   ;;  %s590_s19 = sphi %s632_s19, %s756_s19   ;;  %s586_s18 = sphi %s630_s18, %s755_s18   ;;  %s582_s17 = sphi %s628_s17, %s754_s17   ;;  %s578_s16 = sphi %s626_s16, %s753_s16   ;;  %s574_s15 = sphi %s624_s15, %s752_s15  }
   0x5   : > { %s26_s23 = sadd.s32 1, %s590_s19  ;;  %s139_s24 = sadd.s32 1, %s582_s17 }
   0x6   : > { %p27_p0 = scmp.ge.s32.totalorder %s26_s23, 2  ;;  %p149_p1 = scmp.ne.s32.totalorder %s582_s17, %s578_s16 }
   0x7   : > { %p150_p2 = scmp.eq.s32.totalorder %s433_s21, 1  ;;  %p155_p3 = scmp.ne.s32.totalorder %s578_s16, %s574_s15 }
   0x8   : > { %s758_s23 = smov (%p27_p0, %s26_s23), 0  ;;  %p156_p5 = scmp.eq.s32.totalorder %s434_s22, 1 }
   0x9   : > { %p664_p4 = por %p150_p2, %p149_p1  ;;  %s134_s26 = ssub.s32 %s590_s19, %s758_s23 }
   0xa   : > { %p439_p6 = scmp.ge.s32.totalorder %s594_s20, 1  ;;  %p137_p7 = scmp.eq.s32.totalorder %s134_s26, 0 }
   0xb   : > { %p671_p8 = por %p156_p5, %p155_p3  ;;  %p202_p9 = scmp.lt.s32.totalorder %s594_s20, 3 }
   0xc   : > { %s677_s28 = scalar_select %p137_p7, %s582_s17, %s139_s24  }
   0xd   : > { %p203_p10 = pnand %p439_p6, %p202_p9 }
   0xe   : > { %p239_p11 = scmp.lt.s32.totalorder (!%p203_p10), %s586_s18, 1  ;;  %v596_v0 = vmov (!%p203_p10), 0.0   ;;  %vm597_vm0 = vmmov (!%p203_p10), 0   ;;  %v258_v2 = vld [vmem:[%s746_s1] sm:$0x3] (!%p203_p10)  ;;  %vm265_vm1 = vcmask (!%p203_p10), 130048  }
   0xf   : > { %206 = sbr.rel (%p203_p10) target bundleno = 260 (0x104), region = 36  ;;  %452 = vmatprep.subr.bf16.mxu0 (!%p203_p10), %v596_v0  ;;  %454 = vmatprep.mubr.msk.bf16.mxu0 (!%p203_p10), %vm597_vm0, %v596_v0  ;;  %s236_s10 = sand.u32 (!%p203_p10), 1, %s578_s16   ;;  %v309_v3 = vld [vmem:[%s747_s2] sm:$0xf] (!%p203_p10) }
  0x10   : > { %s440_s11 = sshll.u32 (!%p203_p10), %s236_s10, 2  ;;  %v311_v5 = vld [vmem:[%s748_s3] sm:$0xf] (!%p203_p10)  ;;  %s446_s22 = sshll.u32 (!%p203_p10), %s586_s18, 6 }
  0x11   : > { %s238_s24 = scalar_lea.vmem (!%p203_p10), [#allocation2], %s440_s11  ;;  %s698_s5 = scalar_lea.hbm (!%p203_p10), %s749_s4, %s446_s22 }
  0x12   : > { %s329_s26 = sshll.u32 (!%p203_p10), %s238_s24, 4  ;;  %s315_s6 = scalar_lea.sflag (!%p203_p10), [#allocation3], %s236_s10  ;;  %s700_s26 = int_to_ptr.vmem [resolvable:$true] %s329_s26 }
  0x16   : > { %s240_s29 = scalar_select %p239_p11, %s586_s18, 1 }
  0x17   : > { %s516_s18 = scalar_lea.vmem %s700_s26, 64 }
  0x18   : > { %s449_s30 = sshll.u32 %s240_s29, 3  ;;  %p517_p12 = scmp.ne.s32.totalorder %s700_s26, %s516_s18 }
  0x19   : > { %s246_s7 = scalar_lea.vmem %s745_s0, %s449_s30 }
  0x1a   : > { %v515_v1 = vld [vmem:[%s246_s7] sm:$0xff]   ;;  %p518_p13 = pnand %p517_p12, %p664_p4  ;;  %s598_s7 = smov [#allocation2]  }
  0x1b   : > { %453 = vmatpush3.bf16.msra.mxu0 %v515_v1  ;;  %s520_s8 = sshll.u32 %s598_s7, 4  ;;  %s521_s8 = int_to_ptr.vmem [resolvable:$false] %s520_s8 }
  0x1c   : > { %p519_p0 = pneg %p518_p13  ;;  %s522_s9 = scalar_lea.vmem %s521_s8, 128 }
  0x1d   : > { %p523_p1 = scmp.lt.s32.totalorder %s700_s26, %s521_s8  ;;  %p524_p2 = scmp.lt.s32.totalorder %s522_s9, %s516_s18 }
  0x1e   : > { %455 = vmatmul.mubr.msk.bf16.vlgmr.msra.gmra.mrb[0].mxu0 %vm265_vm1, %v258_v2 }
  0x1f   : > { %p525_p3 = por %p524_p2, %p523_p1 }
  0x21   : > { %p526_p5 = pnand %p525_p3, %p519_p0 }
  0xf1   : > { %v303_v4 = vpop.f32.mrb[0].mxu0 }
  0xf2   : > { %v310_v6 = vmul.f32 %v309_v3, %v303_v4  ;;  %v456_v7 = vpop.f32.mrb[1].mxu0 }
  0xf3   : > { %v306_v8 = vpop.f32.mrb[2].mxu0 }
  0xf4   : > { %v312_v9 = vadd.f32 %v311_v5, %v310_v6  ;;  %v457_v10 = vpop.f32.mrb[3].mxu0 }
  0xf6   : > { %313 = vst [vmem:[%s238_s24] sm:$0xf] %v312_v9 }
  0xf7   : > { %529 = shalt.err (!%p526_p5)
}
  0xf8   : > { %s530_s10 = scalar_lea.hbm %s698_s5, 64  ;;  %s534_s13 = scalar_lea.hbm %s749_s4, 128 }
  0xf9   : > { %p531_p6 = scmp.ne.s32.totalorder %s698_s5, %s530_s10  ;;  %p535_p10 = scmp.lt.u32.totalorder %s698_s5, %s749_s4 }
  0xfa   : > { %p536_p11 = scmp.lt.u32.totalorder %s534_s13, %s530_s10  ;;  %p538_p13 = scmp.lt.u32.totalorder %s530_s10, %s698_s5 }
  0xfb   : > { %p532_p7 = pnand %p531_p6, %p664_p4 }
  0xfc   : > { %p537_p12 = por %p536_p11, %p535_p10 }
  0xfd   : > { %p533_p9 = pneg %p532_p7 }
  0xfe   : > { %p539_p0 = por %p538_p13, %p537_p12 }
 0x100   : > { %p540_p1 = pnand %p539_p0, %p533_p9 }
 0x102   : > { %543 = shalt.err (!%p540_p1)
}
 0x103   : > { %458 = dma.vmem_to_hbm [thread:$0]  (%p664_p4), %s700_s26, 64, %s698_s5, %s315_s6  }
 0x104 PF: > { %p464_p2 = scmp.ge.s32.totalorder %s594_s20, 2  ;;  %s341_s22 = sand.u32 1, %s574_s15  }
 0x105   : > { %s342_s24 = scalar_lea.sflag [#allocation3], %s341_s22 }
 0x106   : > { %p461_p3 = pnand %p464_p2, %p671_p8 }
 0x108   : > { %569 = dma.done.wait (!%p461_p3), %s342_s24, 64  }
 0x109   : > { %571 = vsyncadd (!%p461_p3), %s342_s24, 4294967232  ;;  %s17_s20 = sadd.s32 1, %s594_s20   ;;  %s752_s15 = smov %s578_s16 }
 0x10a   : > { %p14_p5 = scmp.ge.s32.totalorder %s17_s20, 4   ;;  %s753_s16 = smov %s582_s17 }
 0x10b   : > { %s754_s17 = smov %s677_s28  ;;  %s755_s18 = smov %s590_s19 }
 0x10c   : > { %s756_s19 = smov %s758_s23  ;;  %16 = sbr.rel (!%p14_p5) target bundleno = 4 (0x4), region = 77 }
 0x113   :  { %347 = vsyncpa [#allocation3], 1 }
 0x114   :  { %349 = vsyncpa [#allocation3 + $0x1], 1 }

</bundles_post_ra>
